<compile_context>
chip_gen: v5e
topology: v5e:2x2
jax: 0.10.0
libtpu: 0.0.40
codegen_flags: <defaults>
</compile_context>

<pallas_src>
import functools

import jax
import jax.numpy as jnp
from jax import lax
from jax.experimental import pallas as pl
from jax.experimental.pallas import tpu as pltpu


def _round_up(x, m):
    return ((x + m - 1) // m) * m


def _det_head_kernel(feat_ref, wT_ref, b_ref, rk_ref, out_ref, *, embed_dim):
    E = embed_dim
    x = feat_ref[...]                         # [Cin, TM]   lane-dense activations
    wT = wT_ref[...]                          # [NMM, Cin]  folded 1x1-conv weights
    # 1x1 conv, channel-major: yT[c, p] = sum_k W[k, c] * x[k, p]
    yT = jnp.dot(wT, x, preferred_element_type=jnp.float32)   # [NMM, TM]
    yT = yT + b_ref[...]                      # bias [NMM, 1] broadcast over lanes

    # ---- quaternion branch: F.normalize(dim=channel, eps=1e-12) ----
    q0 = yT[0:1, :]
    q1 = yT[1:2, :]
    q2 = yT[2:3, :]
    q3 = yT[3:4, :]
    s_pre = q0 * q0 + q1 * q1 + q2 * q2 + q3 * q3
    inv = lax.rsqrt(jnp.maximum(s_pre, 1e-24))     # == 1/max(||q||, 1e-12), EUP rsqrt
    qw = q0 * inv
    qx = q1 * inv
    qy = q2 * inv
    qz = q3 * inv

    # ---- quaternion (w,x,y,z) -> LOCAL rotation rows (pytorch3d convention) ----
    two_s = 2.0 / (s_pre * (inv * inv))            # == 2/||q_n||^2 (≈2), reference semantics
    xx = qx * qx; yy = qy * qy; zz = qz * qz
    xy = qx * qy; xz = qx * qz; yz = qy * qz
    wx = qw * qx; wy = qw * qy; wz = qw * qz
    r_rows = jnp.concatenate(
        [1.0 - two_s * (yy + zz), two_s * (xy - wz), two_s * (xz + wy),
         two_s * (xy + wz), 1.0 - two_s * (xx + zz), two_s * (yz - wx),
         two_s * (xz - wy), two_s * (yz + wx), 1.0 - two_s * (xx + yy)],
        axis=0)                                    # [9, TM]
    # TODO(synk): on v7x at very large TM the [1, TM] rows are 1/8-sublane dense; if a
    # bundle dump shows VALU as the binding slot, relayout quat rows to [TM//128, 128].

    # ---- confidence branch: sigmoid (exp + reciprocal land on the EUP) ----
    conf = pl.reciprocal(1.0 + jnp.exp(-yT[7 + E:8 + E, :]), approx=True)

    # ---- direct lane-dense sub-block stores (rows == output channels) ----
    out_ref[0:4, :] = jnp.concatenate([qw, qx, qy, qz], axis=0).astype(out_ref.dtype)
    out_ref[4:7 + E, :] = yT[4:7 + E, :].astype(out_ref.dtype)          # trans + embed
    out_ref[7 + E:8 + E, :] = conf.astype(out_ref.dtype)
    # global_R = R_ext @ R_loc  via one tiny [9,9] kron(R_ext, I3) MXU matmul
    gR = jnp.dot(rk_ref[...], r_rows, preferred_element_type=jnp.float32)   # [9, TM]
    out_ref[8 + E:17 + E, :] = gR.astype(out_ref.dtype)
    out_ref[17 + E:20 + E, :] = yT[8 + E:11 + E, :].astype(out_ref.dtype)   # global_trans


def candidate_pose_forward(feat_map, params, K=None, extrinsics=None, tm_max=4096):
    """feat_map: NCHW [B, Cin, H, W] (f32 or bf16). Returns dict matching the PyTorch module."""
    B, Cin, H, W = feat_map.shape
    E = int(params["embed_dim"])
    NMM = 11 + E            # quat(4) | trans(3) | embed(E) | conf(1) | global_trans(3)
    OUT_W = 20 + E          # ... + global_R(9)
    HW = H * W

    # --- pixel tile: multiple of 128; prefer one that divides the 128-padded extent ---
    HW128 = _round_up(HW, 128)
    tm_cap = max(128, min(_round_up(tm_max, 128), HW128))
    if B == 1 and HW128 >= 256:                       # v7x megacore: keep >= 2 parallel blocks
        tm_cap = min(tm_cap, max(128, _round_up(HW128 // 2, 128)))
    TM = next((c for c in range(tm_cap, 127, -128) if HW128 % c == 0), tm_cap)
    n_t = pl.cdiv(HW, TM)
    HWp = n_t * TM

    # NCHW -> [B, Cin, HW]: a free view, channel-major all the way into the kernel.
    feat = feat_map.reshape(B, Cin, HW)
    if HWp != HW:
        feat = jnp.pad(feat, ((0, 0), (0, 0), (0, HWp - HW)))
    in_dtype = feat.dtype                              # bf16 in -> bf16 MXU feed, f32 accumulate

    if extrinsics is None:
        r_ext = jnp.broadcast_to(jnp.eye(3, dtype=jnp.float32), (B, 3, 3))
        t_ext = jnp.zeros((B, 3), jnp.float32)
    else:
        r_ext = extrinsics[:, :3, :3].astype(jnp.float32)
        t_ext = extrinsics[:, :3, 3].astype(jnp.float32)

    hp = lax.Precision.HIGHEST
    w = params["w"].astype(jnp.float32)                # [Cin, 8+E]
    b = params["b"].astype(jnp.float32)                # [8+E]

    # Fold global_trans into the conv: W_gt^T = R_ext @ W_trans^T, b_gt = R_ext b_t + t_ext
    wT_gt = jnp.einsum('bij,cj->bic', r_ext, w[:, 4:7], precision=hp)        # [B, 3, Cin]
    b_gt = jnp.einsum('bij,j->bi', r_ext, b[4:7], precision=hp) + t_ext      # [B, 3]
    wT_all = jnp.concatenate(
        [jnp.broadcast_to(w.T[None], (B, 8 + E, Cin)), wT_gt], axis=1)       # [B, NMM, Cin]
    b_all = jnp.concatenate(
        [jnp.broadcast_to(b[None], (B, 8 + E)), b_gt], axis=1)[:, :, None]   # [B, NMM, 1]
    rkron = jax.vmap(lambda R: jnp.kron(R, jnp.eye(3, dtype=jnp.float32)))(r_ext)  # [B, 9, 9]
    wT_all = wT_all.astype(in_dtype)

    cost = pl.CostEstimate(
        flops=2 * B * HWp * (Cin * NMM + 81),
        transcendentals=3 * B * HWp,
        bytes_accessed=(B * HWp * (Cin * feat.dtype.itemsize + OUT_W * 4)
                        + B * (NMM * (Cin + 1) + 81) * 4),
    )

    grid = (B, n_t)   # batch outer => per-batch folded weights DMA'd only B times
    out = pl.pallas_call(
        functools.partial(_det_head_kernel, embed_dim=E),
        out_shape=jax.ShapeDtypeStruct((B, OUT_W, HWp), jnp.float32),
        grid_spec=pltpu.PrefetchScalarGridSpec(
            num_scalar_prefetch=0,
            grid=grid,
            in_specs=[
                pl.BlockSpec((None, Cin, TM), lambda bq, t: (bq, 0, t)),     # feat (channel-major)
                pl.BlockSpec((None, NMM, Cin), lambda bq, t: (bq, 0, 0)),    # folded W^T
                pl.BlockSpec((None, NMM, 1), lambda bq, t: (bq, 0, 0)),      # folded bias
                pl.BlockSpec((None, 9, 9), lambda bq, t: (bq, 0, 0)),        # kron(R_ext, I3)
            ],
            out_specs=pl.BlockSpec((None, OUT_W, TM), lambda bq, t: (bq, 0, t)),
        ),
        compiler_params=pltpu.CompilerParams(
            dimension_semantics=("parallel", "parallel"),
            vmem_limit_bytes=32 * 1024 * 1024),        # few-MiB need; safe on 64 MiB v7x
        cost_estimate=cost,
    )(feat, wT_all, b_all, rkron)

    if HWp != HW:
        out = out[:, :, :HW]   # TODO(synk): consumers could view-slice the padded slab instead

    # Channel-major output -> NCHW by pure slicing/reshape (no transposes).
    def chan(lo, hi):
        return out[:, lo:hi, :].reshape(B, hi - lo, H, W)

    return {
        'quat': chan(0, 4),
        'trans': chan(4, 7),
        'embed': chan(7, 7 + E),
        'conf': chan(7 + E, 8 + E),
        'global_R': out[:, 8 + E:17 + E, :].reshape(B, 3, 3, H, W),
        'global_trans': chan(17 + E, 20 + E),
    }
    # TODO(synk): decode_poses / match_and_decode are host-side top-k + python dict
    # post-processing; not part of the forward hot path, left un-kernelized.


# ----------------------- pure-JAX reference (for verification) -----------------------
def reference_forward(feat_map, params, extrinsics):
    E = params["embed_dim"]
    y = jnp.einsum('bchw,cd->bdhw', feat_map.astype(jnp.float32), params["w"],
                   precision=jax.lax.Precision.HIGHEST)
    y = y + params["b"][None, :, None, None]
    quat = y[:, 0:4]
    n = jnp.sqrt(jnp.sum(quat * quat, axis=1, keepdims=True))
    quat = quat / jnp.maximum(n, 1e-12)
    trans = y[:, 4:7]
    embed = y[:, 7:7 + E]
    conf = jax.nn.sigmoid(y[:, 7 + E:8 + E])
    qw, qx, qy, qz = quat[:, 0], quat[:, 1], quat[:, 2], quat[:, 3]
    s = qw * qw + qx * qx + qy * qy + qz * qz
    ts = 2.0 / s
    rows = [1 - ts * (qy * qy + qz * qz), ts * (qx * qy - qz * qw), ts * (qx * qz + qy * qw),
            ts * (qx * qy + qz * qw), 1 - ts * (qx * qx + qz * qz), ts * (qy * qz - qx * qw),
            ts * (qx * qz - qy * qw), ts * (qy * qz + qx * qw), 1 - ts * (qx * qx + qy * qy)]
    B, _, H, W = feat_map.shape
    R = jnp.stack(rows, axis=1).reshape(B, 3, 3, H, W)
    Rext = extrinsics[:, :3, :3]
    text = extrinsics[:, :3, 3]
    gR = jnp.einsum('bij,bjkhw->bikhw', Rext, R, precision=jax.lax.Precision.HIGHEST)
    gt = jnp.einsum('bij,bjhw->bihw', Rext, trans,
                    precision=jax.lax.Precision.HIGHEST) + text[:, :, None, None]
    return {'quat': quat, 'trans': trans, 'embed': embed, 'conf': conf,
            'global_R': gR, 'global_trans': gt}


def _quat_to_rot(q):
    q = q / jnp.linalg.norm(q)
    w, x, y, z = q[0], q[1], q[2], q[3]
    return jnp.array([[1 - 2 * (y * y + z * z), 2 * (x * y - z * w), 2 * (x * z + y * w)],
                      [2 * (x * y + z * w), 1 - 2 * (x * x + z * z), 2 * (y * z - x * w)],
                      [2 * (x * z - y * w), 2 * (y * z + x * w), 1 - 2 * (x * x + y * y)]],
                     dtype=jnp.float32)


if __name__ == "__main__":
    key = jax.random.PRNGKey(0)
    B, Cin, H, W = 2, 32, 16, 16          # feature_dim=32, 16x16 feature map
    E = 16                                # embedding branch width
    out_raw = 4 + 3 + E + 1

    k1, k2, k3, k4, k5 = jax.random.split(key, 5)
    feat_map = jax.random.normal(k1, (B, Cin, H, W), jnp.float32)
    params = {
        "w": 0.1 * jax.random.normal(k2, (Cin, out_raw), jnp.float32),
        "b": 0.05 * jax.random.normal(k3, (out_raw,), jnp.float32),
        "embed_dim": E,
    }
    # deterministic synthetic camera intrinsics / extrinsics
    q_ext = jax.random.normal(k4, (B, 4), jnp.float32)
    R_ext = jax.vmap(_quat_to_rot)(q_ext)
    t_ext = jax.random.normal(k5, (B, 3), jnp.float32)
    extrinsics = (jnp.zeros((B, 4, 4), jnp.float32)
                  .at[:, :3, :3].set(R_ext)
                  .at[:, :3, 3].set(t_ext)
                  .at[:, 3, 3].set(1.0))
    Kmat = jnp.broadcast_to(jnp.eye(3, dtype=jnp.float32), (B, 3, 3))

    out = candidate_pose_forward(feat_map, params, K=Kmat, extrinsics=extrinsics)
    jax.block_until_ready(out)

    ref = reference_forward(feat_map, params, extrinsics)
    for name in ('quat', 'trans', 'embed', 'conf', 'global_R', 'global_trans'):
        diff = float(jnp.max(jnp.abs(out[name] - ref[name])))
        assert diff < 1e-2, (name, diff)

    print("KERNEL_OK")
</pallas_src>

<mosaic_0001>
module attributes {stable_mosaic.version = 11 : i64} {
  func.func @_det_head_kernel(%arg0: i32, %arg1: i32, %arg2: memref<1x32x256xf32, #tpu.memory_space<vmem>>, %arg3: memref<1x27x32xf32, #tpu.memory_space<vmem>>, %arg4: memref<1x27x1xf32, #tpu.memory_space<vmem>>, %arg5: memref<1x9x9xf32, #tpu.memory_space<vmem>>, %arg6: memref<1x36x256xf32, #tpu.memory_space<vmem>>) attributes {dimension_semantics = [#tpu.dimension_semantics<parallel>, #tpu.dimension_semantics<parallel>], iteration_bounds = array<i64: 2, 1>, scalar_prefetch = 0 : i64, scratch_operands = 0 : i64, tpu.core_type = #tpu.core_type<tc>, window_params = [{transform_indices = @transform_0, window_bounds = array<i64: 1, 32, 256>}, {transform_indices = @transform_1, window_bounds = array<i64: 1, 27, 32>}, {transform_indices = @transform_2, window_bounds = array<i64: 1, 27, 1>}, {transform_indices = @transform_3, window_bounds = array<i64: 1, 9, 9>}, {transform_indices = @transform_4, window_bounds = array<i64: 1, 36, 256>}]} {
    %c0 = arith.constant 0 : index
    %c0_0 = arith.constant 0 : index
    %c0_1 = arith.constant 0 : index
    %0 = vector.load %arg2[%c0, %c0_0, %c0_1] : memref<1x32x256xf32, #tpu.memory_space<vmem>>, vector<1x32x256xf32>
    %1 = vector.shape_cast %0 : vector<1x32x256xf32> to vector<32x256xf32>
    %c0_2 = arith.constant 0 : index
    %c0_3 = arith.constant 0 : index
    %c0_4 = arith.constant 0 : index
    %2 = vector.load %arg3[%c0_2, %c0_3, %c0_4] : memref<1x27x32xf32, #tpu.memory_space<vmem>>, vector<1x27x32xf32>
    %3 = vector.shape_cast %2 : vector<1x27x32xf32> to vector<27x32xf32>
    %cst = arith.constant dense<0.000000e+00> : vector<27x256xf32>
    %4 = tpu.matmul %3, %1, %cst {dimension_numbers = #tpu.dot_dimension_numbers<[1], [0], [0], [1], [0, 0, 1, 1], [], []>} : vector<27x32xf32>, vector<32x256xf32>, vector<27x256xf32> -> vector<27x256xf32>
    %c0_5 = arith.constant 0 : index
    %c0_6 = arith.constant 0 : index
    %c0_7 = arith.constant 0 : index
    %5 = vector.load %arg4[%c0_5, %c0_6, %c0_7] : memref<1x27x1xf32, #tpu.memory_space<vmem>>, vector<1x27x1xf32>
    %6 = vector.shape_cast %5 : vector<1x27x1xf32> to vector<27x1xf32>
    %7 = vector.broadcast %6 : vector<27x1xf32> to vector<27x256xf32>
    %8 = arith.addf %4, %7 : vector<27x256xf32>
    %9 = vector.extract_strided_slice %8 {offsets = [0, 0], sizes = [1, 256], strides = [1, 1]} : vector<27x256xf32> to vector<1x256xf32>
    %10 = vector.extract_strided_slice %8 {offsets = [1, 0], sizes = [1, 256], strides = [1, 1]} : vector<27x256xf32> to vector<1x256xf32>
    %11 = vector.extract_strided_slice %8 {offsets = [2, 0], sizes = [1, 256], strides = [1, 1]} : vector<27x256xf32> to vector<1x256xf32>
    %12 = vector.extract_strided_slice %8 {offsets = [3, 0], sizes = [1, 256], strides = [1, 1]} : vector<27x256xf32> to vector<1x256xf32>
    %13 = arith.mulf %9, %9 : vector<1x256xf32>
    %14 = arith.mulf %10, %10 : vector<1x256xf32>
    %15 = arith.addf %13, %14 : vector<1x256xf32>
    %16 = arith.mulf %11, %11 : vector<1x256xf32>
    %17 = arith.addf %15, %16 : vector<1x256xf32>
    %18 = arith.mulf %12, %12 : vector<1x256xf32>
    %19 = arith.addf %17, %18 : vector<1x256xf32>
    %cst_8 = arith.constant 1.000000e-24 : f32
    %20 = vector.broadcast %cst_8 : f32 to vector<1x256xf32>
    %21 = arith.maximumf %19, %20 : vector<1x256xf32>
    %22 = math.rsqrt %21 : vector<1x256xf32>
    %23 = arith.mulf %9, %22 : vector<1x256xf32>
    %24 = arith.mulf %10, %22 : vector<1x256xf32>
    %25 = arith.mulf %11, %22 : vector<1x256xf32>
    %26 = arith.mulf %12, %22 : vector<1x256xf32>
    %27 = arith.mulf %22, %22 : vector<1x256xf32>
    %28 = arith.mulf %19, %27 : vector<1x256xf32>
    %cst_9 = arith.constant 2.000000e+00 : f32
    %29 = vector.broadcast %cst_9 : f32 to vector<1x256xf32>
    %30 = arith.divf %29, %28 : vector<1x256xf32>
    %31 = arith.mulf %24, %24 : vector<1x256xf32>
    %32 = arith.mulf %25, %25 : vector<1x256xf32>
    %33 = arith.mulf %26, %26 : vector<1x256xf32>
    %34 = arith.mulf %24, %25 : vector<1x256xf32>
    %35 = arith.mulf %24, %26 : vector<1x256xf32>
    %36 = arith.mulf %25, %26 : vector<1x256xf32>
    %37 = arith.mulf %23, %24 : vector<1x256xf32>
    %38 = arith.mulf %23, %25 : vector<1x256xf32>
    %39 = arith.mulf %23, %26 : vector<1x256xf32>
    %40 = arith.addf %32, %33 : vector<1x256xf32>
    %41 = arith.mulf %30, %40 : vector<1x256xf32>
    %cst_10 = arith.constant 1.000000e+00 : f32
    %42 = vector.broadcast %cst_10 : f32 to vector<1x256xf32>
    %43 = arith.subf %42, %41 : vector<1x256xf32>
    %44 = arith.subf %34, %39 : vector<1x256xf32>
    %45 = arith.mulf %30, %44 : vector<1x256xf32>
    %46 = arith.addf %35, %38 : vector<1x256xf32>
    %47 = arith.mulf %30, %46 : vector<1x256xf32>
    %48 = arith.addf %34, %39 : vector<1x256xf32>
    %49 = arith.mulf %30, %48 : vector<1x256xf32>
    %50 = arith.addf %31, %33 : vector<1x256xf32>
    %51 = arith.mulf %30, %50 : vector<1x256xf32>
    %cst_11 = arith.constant 1.000000e+00 : f32
    %52 = vector.broadcast %cst_11 : f32 to vector<1x256xf32>
    %53 = arith.subf %52, %51 : vector<1x256xf32>
    %54 = arith.subf %36, %37 : vector<1x256xf32>
    %55 = arith.mulf %30, %54 : vector<1x256xf32>
    %56 = arith.subf %35, %38 : vector<1x256xf32>
    %57 = arith.mulf %30, %56 : vector<1x256xf32>
    %58 = arith.addf %36, %37 : vector<1x256xf32>
    %59 = arith.mulf %30, %58 : vector<1x256xf32>
    %60 = arith.addf %31, %32 : vector<1x256xf32>
    %61 = arith.mulf %30, %60 : vector<1x256xf32>
    %cst_12 = arith.constant 1.000000e+00 : f32
    %62 = vector.broadcast %cst_12 : f32 to vector<1x256xf32>
    %63 = arith.subf %62, %61 : vector<1x256xf32>
    %64 = tpu.concatenate %43, %45, %47, %49, %53, %55, %57, %59, %63 in 0 : vector<1x256xf32>, vector<1x256xf32>, vector<1x256xf32>, vector<1x256xf32>, vector<1x256xf32>, vector<1x256xf32>, vector<1x256xf32>, vector<1x256xf32>, vector<1x256xf32> -> vector<9x256xf32>
    %65 = vector.extract_strided_slice %8 {offsets = [23, 0], sizes = [1, 256], strides = [1, 1]} : vector<27x256xf32> to vector<1x256xf32>
    %cst_13 = arith.constant 0.000000e+00 : f32
    %66 = vector.broadcast %cst_13 : f32 to vector<1x256xf32>
    %67 = arith.subf %66, %65 : vector<1x256xf32>
    %68 = math.exp %67 : vector<1x256xf32>
    %cst_14 = arith.constant 1.000000e+00 : f32
    %69 = vector.broadcast %cst_14 : f32 to vector<1x256xf32>
    %70 = arith.addf %69, %68 : vector<1x256xf32>
    %71 = tpu.reciprocal %70 {approx = true} : vector<1x256xf32> -> vector<1x256xf32>
    %72 = tpu.concatenate %23, %24, %25, %26 in 0 : vector<1x256xf32>, vector<1x256xf32>, vector<1x256xf32>, vector<1x256xf32> -> vector<4x256xf32>
    %c0_15 = arith.constant 0 : index
    %c0_16 = arith.constant 0 : index
    %c0_17 = arith.constant 0 : index
    %73 = vector.load %arg6[%c0_15, %c0_16, %c0_17] : memref<1x36x256xf32, #tpu.memory_space<vmem>>, vector<1x4x256xf32>
    %74 = vector.shape_cast %73 : vector<1x4x256xf32> to vector<4x256xf32>
    %75 = vector.shape_cast %72 : vector<4x256xf32> to vector<1x4x256xf32>
    tpu.vector_store %arg6[%c0_15, %c0_16, %c0_17], %75 {strides = array<i32>} : memref<1x36x256xf32, #tpu.memory_space<vmem>>, vector<1x4x256xf32>,
    %76 = vector.extract_strided_slice %8 {offsets = [4, 0], sizes = [19, 256], strides = [1, 1]} : vector<27x256xf32> to vector<19x256xf32>
    %c0_18 = arith.constant 0 : index
    %c4 = arith.constant 4 : index
    %c0_19 = arith.constant 0 : index
    %77 = vector.load %arg6[%c0_18, %c4, %c0_19] : memref<1x36x256xf32, #tpu.memory_space<vmem>>, vector<1x19x256xf32>
    %78 = vector.shape_cast %77 : vector<1x19x256xf32> to vector<19x256xf32>
    %79 = vector.shape_cast %76 : vector<19x256xf32> to vector<1x19x256xf32>
    tpu.vector_store %arg6[%c0_18, %c4, %c0_19], %79 {strides = array<i32>} : memref<1x36x256xf32, #tpu.memory_space<vmem>>, vector<1x19x256xf32>,
    %c0_20 = arith.constant 0 : index
    %c23 = arith.constant 23 : index
    %c0_21 = arith.constant 0 : index
    %80 = vector.load %arg6[%c0_20, %c23, %c0_21] : memref<1x36x256xf32, #tpu.memory_space<vmem>>, vector<1x1x256xf32>
    %81 = vector.shape_cast %80 : vector<1x1x256xf32> to vector<1x256xf32>
    %82 = vector.shape_cast %71 : vector<1x256xf32> to vector<1x1x256xf32>
    tpu.vector_store %arg6[%c0_20, %c23, %c0_21], %82 {strides = array<i32>} : memref<1x36x256xf32, #tpu.memory_space<vmem>>, vector<1x1x256xf32>,
    %c0_22 = arith.constant 0 : index
    %c0_23 = arith.constant 0 : index
    %c0_24 = arith.constant 0 : index
    %83 = vector.load %arg5[%c0_22, %c0_23, %c0_24] : memref<1x9x9xf32, #tpu.memory_space<vmem>>, vector<1x9x9xf32>
    %84 = vector.shape_cast %83 : vector<1x9x9xf32> to vector<9x9xf32>
    %cst_25 = arith.constant dense<0.000000e+00> : vector<9x256xf32>
    %85 = tpu.matmul %84, %64, %cst_25 {dimension_numbers = #tpu.dot_dimension_numbers<[1], [0], [0], [1], [0, 0, 1, 1], [], []>} : vector<9x9xf32>, vector<9x256xf32>, vector<9x256xf32> -> vector<9x256xf32>
    %c0_26 = arith.constant 0 : index
    %c24 = arith.constant 24 : index
    %c0_27 = arith.constant 0 : index
    %86 = vector.load %arg6[%c0_26, %c24, %c0_27] : memref<1x36x256xf32, #tpu.memory_space<vmem>>, vector<1x9x256xf32>
    %87 = vector.shape_cast %86 : vector<1x9x256xf32> to vector<9x256xf32>
    %88 = vector.shape_cast %85 : vector<9x256xf32> to vector<1x9x256xf32>
    tpu.vector_store %arg6[%c0_26, %c24, %c0_27], %88 {strides = array<i32>} : memref<1x36x256xf32, #tpu.memory_space<vmem>>, vector<1x9x256xf32>,
    %89 = vector.extract_strided_slice %8 {offsets = [24, 0], sizes = [3, 256], strides = [1, 1]} : vector<27x256xf32> to vector<3x256xf32>
    %c0_28 = arith.constant 0 : index
    %c33 = arith.constant 33 : index
    %c0_29 = arith.constant 0 : index
    %90 = vector.load %arg6[%c0_28, %c33, %c0_29] : memref<1x36x256xf32, #tpu.memory_space<vmem>>, vector<1x3x256xf32>
    %91 = vector.shape_cast %90 : vector<1x3x256xf32> to vector<3x256xf32>
    %92 = vector.shape_cast %89 : vector<3x256xf32> to vector<1x3x256xf32>
    tpu.vector_store %arg6[%c0_28, %c33, %c0_29], %92 {strides = array<i32>} : memref<1x36x256xf32, #tpu.memory_space<vmem>>, vector<1x3x256xf32>,
    return
  }
  func.func @transform_0(%arg0: i32, %arg1: i32) -> (i32, i32, i32) {
    %c0_i32 = arith.constant 0 : i32
    %c0_i32_0 = arith.constant 0 : i32
    return %arg0, %c0_i32, %arg1 : i32, i32, i32
  }
  func.func @transform_1(%arg0: i32, %arg1: i32) -> (i32, i32, i32) {
    %c0_i32 = arith.constant 0 : i32
    %c0_i32_0 = arith.constant 0 : i32
    %c0_i32_1 = arith.constant 0 : i32
    return %arg0, %c0_i32, %c0_i32_0 : i32, i32, i32
  }
  func.func @transform_2(%arg0: i32, %arg1: i32) -> (i32, i32, i32) {
    %c0_i32 = arith.constant 0 : i32
    %c0_i32_0 = arith.constant 0 : i32
    %c0_i32_1 = arith.constant 0 : i32
    return %arg0, %c0_i32, %c0_i32_0 : i32, i32, i32
  }
  func.func @transform_3(%arg0: i32, %arg1: i32) -> (i32, i32, i32) {
    %c0_i32 = arith.constant 0 : i32
    %c0_i32_0 = arith.constant 0 : i32
    %c0_i32_1 = arith.constant 0 : i32
    return %arg0, %c0_i32, %c0_i32_0 : i32, i32, i32
  }
  func.func @transform_4(%arg0: i32, %arg1: i32) -> (i32, i32, i32) {
    %c0_i32 = arith.constant 0 : i32
    %c0_i32_0 = arith.constant 0 : i32
    return %arg0, %c0_i32, %arg1 : i32, i32, i32
  }
}

</mosaic_0001>

<bundles_post_ra>
// kernel: tpu_custom_call.1
= control target key start
LH: loop header
LB: loop body
LE: loop exit
PB: predicated region body
PF: predicated region fallthrough
CT: control target
= control target key end

     0   :  { %s1116_s15 = smov 0   ;;  %s1118_s16 = smov 0   ;;  %s1383_s0 = inlined_call_operand.vmem [shape: f32[2,32,256], index: 0, kind: input, shape index: {}]   ;;  %s1384_s1 = inlined_call_operand.vmem [shape: f32[2,27,32], index: 1, kind: input, shape index: {}]   ;;  %s1385_s2 = inlined_call_operand.vmem [shape: f32[2,27,1], index: 2, kind: input, shape index: {}]   ;;  %s1386_s3 = inlined_call_operand.vmem [shape: f32[2,9,9], index: 3, kind: input, shape index: {}]   ;;  %s1387_s4 = inlined_call_operand.vmem [shape: f32[2,36,256], index: 4, kind: output, shape index: {}]  }
   0x1   :  { %s1120_s17 = smov 0  }
   0x2 LB: > { %s26_s18 = sadd.s32 1, %s1084_s16  ;;  %p983_p0 = scmp.ge.s32.totalorder %s1088_s17, 1  ;;  %s1088_s17 = sphi %s1120_s17, %s14_s17   ;;  %s1084_s16 = sphi %s1118_s16, %s1395_s16   ;;  %s1080_s15 = sphi %s1116_s15, %s1394_s15  }
   0x3   : > { %p28_p1 = scmp.ge.s32.totalorder %s26_s18, 2  ;;  %p213_p2 = scmp.lt.s32.totalorder %s1088_s17, 3 }
   0x5   : > { %s1397_s18 = smov (%p28_p1, %s26_s18), 0  ;;  %p214_p3 = pnand %p983_p0, %p213_p2 }
   0x6   : > { %p263_p4 = scmp.lt.s32.totalorder (!%p214_p3), %s1080_s15, 1 }
   0x7   : > { %217 = sbr.rel (%p214_p3) target bundleno = 378 (0x17a), region = 36 }
   0xc   : > { %v1090_v0 = vmov 0   ;;  %s1399_s15 = smov (!%p263_p4, %s1080_s15), 1  ;;  %vm333_vm0 = vcmask 261120   ;;  %vm724_vm7 = vcmask 1040384   ;;  %vm727_vm14 = vcmask 1041408  }
   0xd   : > { %1048 = vset.pattern.permute.xlu0 %v1090_v0  ;;  %1049 = vset.pattern.permute.xlu1 %v1090_v0  ;;  %s1010_s19 = sshll.u32 %s1399_s15, 6  ;;  %s1011_s23 = sshll.u32 %s1399_s15, 5 }
   0xe   : > { %s270_s22 = scalar_lea.vmem %s1383_s0, %s1010_s19  ;;  %s1144_s26 = scalar_lea.vmem %s1385_s2, %s1011_s23 }
   0xf   : > { %v303_v1 = vld [vmem:[%s270_s22 + $0x30] sm:$0xff]  ;;  %v304_v2 = vld [vmem:[%s270_s22 + $0x38] sm:$0xff]  ;;  %v301_v3 = vld [vmem:[%s270_s22 + $0x20] sm:$0xff]  ;;  %s1149_s29 = scalar_lea.vmem %s1384_s1, %s1011_s23  ;;  %s1022_s30 = smul.u32 80, %s1399_s15 }
  0x10   : > { %358 = vmatpush.msra.mxu0 %v303_v1  ;;  %387 = vmatpush.msra.mxu1 %v304_v2  ;;  %v302_v4 = vld [vmem:[%s270_s22 + $0x28] sm:$0xff]  ;;  %v299_v5 = vld [vmem:[%s270_s22 + $0x10] sm:$0xff]  ;;  %v300_v6 = vld [vmem:[%s270_s22 + $0x18] sm:$0xff]  ;;  %s1013_s8 = sshll.u32 %s1399_s15, 4 }
  0x11   : > { %1014 = vmatpush.msra.mxu2 %v303_v1  ;;  %1018 = vmatpush.msra.mxu3 %v304_v2  ;;  %v309_v7 = vld [vmem:[%s1144_s26] sm:$0xff]  ;;  %v298_v9 = vld [vmem:[%s270_s22 + $0x8] sm:$0xff]  ;;  %v311_v11 = vld [vmem:[%s1144_s26 + $0x10] sm:$0xff]  ;;  %s1166_s7 = scalar_lea.vmem %s1387_s4, %s1022_s30  ;;  %s1326_s11 = scalar_lea.vmem %s1386_s3, %s1013_s8 }
  0x12   : > { %359 = vmatpush.msra.mxu0 %v301_v3  ;;  %388 = vmatpush.msra.mxu1 %v302_v4  ;;  %v297_v8 = vld [vmem:[%s270_s22] sm:$0xff]  ;;  %v306_v12 = vld [vmem:[%s1149_s29 + $0x8] sm:$0xff]  ;;  %v307_v13 = vld [vmem:[%s1149_s29 + $0x10] sm:$0xff] }
  0x13   : > { %315 = vperm.xlu0 %1048, %v309_v7   ;;  %1015 = vmatpush.msra.mxu2 %v301_v3  ;;  %v305_v10 = vld [vmem:[%s1149_s29] sm:$0xff]  ;;  %v312_v42 = vld [vmem:[%s1144_s26 + $0x18] sm:$0x7]  ;;  %v310_v52 = vld [vmem:[%s1144_s26 + $0x8] sm:$0xff] }
  0x14   : > { %360 = vmatpush.msra.mxu0 %v299_v5  ;;  %389 = vmatpush.msra.mxu1 %v300_v6  ;;  %v308_v1 = vld [vmem:[%s1149_s29 + $0x18] sm:$0x7] }
  0x15   : > { %1019 = vmatpush.msra.mxu3 %v302_v4  ;;  %1016 = vmatpush.msra.mxu2 %v299_v5 }
  0x16   : > { %361 = vmatpush.msra.mxu0 %v297_v8  ;;  %390 = vmatpush.msra.mxu1 %v298_v9 }
  0x17   : > { %993 = vmatmul.msk.f32.vlgmr.msra.gmra.mxu0 %vm333_vm0, %v305_v10  ;;  %997 = vmatmul.msk.f32.vlgmr.msra.gmra.mxu1 %vm333_vm0, %v305_v10 }
  0x18   : > { %1020 = vmatpush.msra.mxu3 %v300_v6  ;;  %1017 = vmatpush.msra.mxu2 %v297_v8 }
  0x19   : > { %330 = vperm.xlu1 %1049, %v312_v42   ;;  %996 = vmatmul.msk.f32.vlgmr.msra.gmra.mxu2 %vm333_vm0, %v308_v1 }
  0x1a   : > { %1021 = vmatpush.msra.mxu3 %v298_v9 }
  0x1b   : > { %325 = vperm.xlu0 %1048, %v311_v11   ;;  %1000 = vmatmul.msk.f32.vlgmr.msra.gmra.mxu3 %vm333_vm0, %v308_v1  ;;  %v776_v11 = vlaneseq }
  0x1d   : > { %vm1216_vm8 = vcmp.lt.s32.totalorder %v776_v11, 256 }
  0x1f   : > { %994 = vmatmul.msk.f32.gmra.mxu0 %vm333_vm0, %v306_v12  ;;  %998 = vmatmul.msk.f32.gmra.mxu1 %vm333_vm0, %v306_v12 }
  0x21   : > { %320 = vperm.xlu1 %1049, %v310_v52  }
  0x27   : > { %995 = vmatmul.msk.f32.gmra.mxu0 %vm333_vm0, %v307_v13  ;;  %999 = vmatmul.msk.f32.gmra.mxu1 %vm333_vm0, %v307_v13 }
  0x85   : > { %v316_v14 = vpop.permute.xlu0 %315 }
  0x8d   : > { %v326_v37 = vpop.permute.xlu0 %325 }
  0x94   : > { %v363_v15 = vpop.f32.mrf.mxu0  ;;  %v392_v16 = vpop.f32.mrf.mxu1 }
  0x95   : > { %v1168_v17 = vadd.f32 %v363_v15, %v316_v14  ;;  %v1170_v18 = vadd.f32 %v392_v16, %v316_v14 }
  0x97   : > { %v404_v19 = vmul.f32 %v1168_v17, %v1168_v17  ;;  %763 = vst [vmem:[%s1166_s7] sm:$0xf0] %v1168_v17  ;;  %v405_v20 = vmul.f32 %v1170_v18, %v1170_v18 }
  0x98   : > { %764 = vst [vmem:[%s1166_s7 + $0x8] sm:$0xf0] %v1170_v18 }
  0x99   : > { %v408_v21 = vrot.slane %v404_v19, 1  ;;  %v409_v22 = vrot.slane %v405_v20, 1  ;;  %v414_v24 = vrot.slane %v404_v19, 2  ;;  %v415_v26 = vrot.slane %v405_v20, 2 }
  0x9a   : > { %v420_v30 = vrot.slane %v404_v19, 3  ;;  %v421_v32 = vrot.slane %v405_v20, 3 }
  0x9b   : > { %v412_v23 = vadd.f32 %v408_v21, %v404_v19  ;;  %v413_v25 = vadd.f32 %v409_v22, %v405_v20 }
  0x9c   : > { %v1180_v27 = vpop.f32.mrf.mxu0  ;;  %v1182_v28 = vpop.f32.mrf.mxu1 }
  0x9d   : > { %v418_v29 = vadd.f32 %v414_v24, %v412_v23  ;;  %v419_v31 = vadd.f32 %v415_v26, %v413_v25 }
  0x9f   : > { %v424_v33 = vadd.f32 %v420_v30, %v418_v29  ;;  %v1184_v34 = vadd.f32 %v421_v32, %v419_v31 }
  0xa1   : > { %v426_v35 = vmax.f32 %v424_v33, 1e-24  ;;  %v427_v36 = vmax.f32 %v1184_v34, 1e-24 }
  0xa3   : > { %1050 = vrsqrt.f32 %v426_v35  ;;  %vm434_vm2 = vweird.f32 %v426_v35  ;;  %vm444_vm5 = vweird.f32 %v427_v36 }
  0xa4   : > { %1052 = vrsqrt.f32 %v427_v36  ;;  %v369_v38 = vpop.f32.mrf.mxu0  ;;  %v398_v39 = vpop.f32.mrf.mxu1 }
  0xa5   : > { %v370_v40 = vadd.f32 %v369_v38, %v326_v37  ;;  %v399_v41 = vadd.f32 %v398_v39, %v326_v37 }
  0xa7   : > { %v745_v43 = vsub.f32 0.0, %v370_v40  ;;  %767 = vst [vmem:[%s1166_s7 + $0x20] sm:$0x7f] %v370_v40  ;;  %v746_v44 = vsub.f32 0.0, %v399_v41 }
  0xa8   : > { %768 = vst [vmem:[%s1166_s7 + $0x28] sm:$0x7f] %v399_v41 }
  0xa9   : > { %v1051_v45 = vpop.eup %1050  ;;  %v747_v46 = vmul.f32 1.442695, %v745_v43  ;;  %v749_v47 = vmul.f32 1.442695, %v746_v44 }
  0xaa   : > { %v1053_v48 = vpop.eup %1052  ;;  %v429_v49 = vmul.f32 %v1051_v45, %v426_v35  ;;  %vm435_vm1 = vweird.f32 %v1051_v45 }
  0xab   : > { %v439_v50 = vmul.f32 %v1053_v48, %v427_v36  ;;  %1054 = vpow2.f32 %v747_v46  ;;  %vm445_vm3 = vweird.f32 %v1053_v48  ;;  %vm436_vm4 = vmor %vm434_vm2, %vm435_vm1  ;;  %vm730_vm1 = vcmask 1042432  }
  0xac   : > { %v430_v51 = vmul.f32 %v1051_v45, %v429_v49  ;;  %1056 = vpow2.f32 %v749_v47  ;;  %vm446_vm6 = vmor %vm444_vm5, %vm445_vm3  ;;  %vm733_vm3 = vcmask 1043456   ;;  %vm739_vm5 = vcmask 1045504  }
  0xad   : > { %v440_v53 = vmul.f32 %v1053_v48, %v439_v50 }
  0xae   : > { %v431_v54 = vmul.f32 0.5, %v430_v51 }
  0xaf   : > { %v441_v55 = vmul.f32 0.5, %v440_v53 }
  0xb0   : > { %v432_v56 = vsub.f32 1.5, %v431_v54 }
  0xb1   : > { %v1055_v57 = vpop.eup %1054  ;;  %v442_v58 = vsub.f32 1.5, %v441_v55 }
  0xb2   : > { %v1057_v59 = vpop.eup %1056  ;;  %v433_v60 = vmul.f32 %v1051_v45, %v432_v56  ;;  %v751_v61 = vadd.f32 1.0, %v1055_v57 }
  0xb3   : > { %v443_v62 = vmul.f32 %v1053_v48, %v442_v58  ;;  %v752_v63 = vadd.f32 1.0, %v1057_v59 }
  0xb4   : > { %v437_v0 = vsel %vm436_vm4, %v1051_v45, %v433_v60  ;;  %1058 = vrcp.f32 %v751_v61  ;;  %vm736_vm4 = vcmask 1044480  }
  0xb5   : > { %v458_v2 = vrot.slane %v437_v0, 6  ;;  %v464_v3 = vrot.slane %v437_v0, 5  ;;  %v452_v4 = vrot.slane %v437_v0, 7  ;;  %v470_v5 = vmul.f32 %v437_v0, %v437_v0 }
  0xb6   : > { %v447_v6 = vsel %vm446_vm6, %v1053_v48, %v443_v62  ;;  %1060 = vrcp.f32 %v752_v63  ;;  %v448_v36 = vmul.f32 %v437_v0, %v1168_v17  ;;  %vm742_vm6 = vcmask 1046528  }
  0xb7   : > { %v1195_v7 = vmul.f32 %v458_v2, %v1168_v17  ;;  %v1198_v8 = vmul.f32 %v464_v3, %v1168_v17  ;;  %v1200_v9 = vmul.f32 %v470_v5, %v424_v33  ;;  %v459_v10 = vrot.slane %v447_v6, 6 }
  0xb8   : > { %v465_v12 = vrot.slane %v447_v6, 5  ;;  %v471_v13 = vmul.f32 %v447_v6, %v447_v6  ;;  %v1205_v16 = vmul.f32 %v452_v4, %v1168_v17  ;;  %v453_v19 = vrot.slane %v447_v6, 7 }
  0xb9   : > { %v508_v14 = vmul.f32 %v1198_v8, %v1198_v8  ;;  %1062 = vrcp.f32 %v1200_v9  ;;  %v506_v20 = vmul.f32 %v1195_v7, %v1195_v7  ;;  %v1214_v23 = vmul.f32 %v459_v10, %v1170_v18 }
  0xba   : > { %v1059_v15 = vpop.eup %1058  ;;  %v1211_v21 = vmul.f32 %v471_v13, %v1184_v34  ;;  %v483_v29 = vand.u32 2147483647, %v1200_v9  ;;  %v485_v30 = vand.u32 2147483648, %v1200_v9  ;;  %v1223_v31 = vmul.f32 %v465_v12, %v1170_v18 }
  0xbb   : > { %771 = vst [vmem:[#allocation1] sm:$0xff] %v1059_v15  ;;  %v554_v25 = vrot.slane %v508_v14, 1  ;;  %v612_v26 = vrot.slane %v508_v14, 2  ;;  %v1227_v32 = vmul.f32 %v453_v19, %v1170_v18  ;;  %v504_v34 = vmul.f32 %v1205_v16, %v1205_v16 }
  0xbc   : > { %v1061_v22 = vpop.eup %1060  ;;  %1064 = vrcp.f32 %v1211_v21  ;;  %v500_v33 = vand.u32 2147483648, %v1211_v21  ;;  %v666_v35 = vrot.slane %v506_v20, 1  ;;  %vm479_vm9 = vweird.f32 %v1200_v9 }
  0xbd   : > { %772 = vst [vmem:[#allocation1 + $0x9] sm:$0xff] %v1061_v22  ;;  %v1235_v37 = vmul.f32 %v447_v6, %v1170_v18  ;;  %v1237_v38 = vadd.f32 %v554_v25, %v506_v20  ;;  %v498_v40 = vand.u32 2147483647, %v1211_v21  ;;  %v1240_v41 = vadd.f32 %v612_v26, %v504_v34 }
  0xbe   : > { %v670_v42 = vadd.f32 %v666_v35, %v504_v34  ;;  %v507_v43 = vmul.f32 %v1214_v23, %v1214_v23  ;;  %vm1245_vm10 = vcmp.eq.f32.partialorder %v483_v29, 8.507059e+37  ;;  %v486_v45 = vor.u32 1.1754944e-38, %v485_v30 }
  0xbf   : > { %v1063_v39 = vpop.eup %1062  ;;  %v1251_v18 = vmul.f32 %v1223_v31, %v1223_v31  ;;  %vm494_vm11 = vweird.f32 %v1211_v21  ;;  %v501_v46 = vor.u32 1.1754944e-38, %v500_v33  ;;  %v1256_v47 = vsel %vm724_vm7, %v448_v36, %v1205_v16 }
  0xc0   : > { %v475_v44 = vmul.f32 %v1063_v39, %v1200_v9  ;;  %v1261_v48 = vsel %vm724_vm7, %v1235_v37, %v1227_v32  ;;  %v505_v49 = vmul.f32 %v1227_v32, %v1227_v32  ;;  %v562_v52 = vrot.slane %v1237_v38, 2 }
  0xc1   : > { %v667_v53 = vrot.slane %v507_v43, 1  ;;  %v512_v54 = vrot.slane %v1195_v7, 1  ;;  %vm480_vm12 = vweird.f32 %v1063_v39  ;;  %vm1268_vm13 = vcmp.eq.f32.partialorder %v498_v40, 8.507059e+37 }
  0xc2   : > { %v1065_v50 = vpop.eup %1064  ;;  %v476_v51 = vsub.f32 1.0, %v475_v44  ;;  %v620_v58 = vrot.slane %v1240_v41, 1  ;;  %v674_v59 = vrot.slane %v670_v42, 1  ;;  %v555_v61 = vrot.slane %v1251_v18, 1  ;;  %vm481_vm15 = vmor %vm479_vm9, %vm480_vm12 }
  0xc3   : > { %v490_v55 = vmul.f32 %v1065_v50, %v1211_v21  ;;  %v520_v62 = vrot.slane %v1198_v8, 2  ;;  %v526_v63 = vrot.slane %v1198_v8, 1  ;;  %v613_v1 = vrot.slane %v1251_v18, 2 }
  0xc4   : > { %v774_v57 = vld [vmem:[#allocation1 + $0x7] ss:$9 sm:$0xff]  ;;  %v477_v60 = vmul.f32 %v1063_v39, %v476_v51  ;;  %v534_v2 = vrot.slane %v1205_v16, 1  ;;  %v540_v3 = vrot.slane %v1195_v7, 2  ;;  %v671_v5 = vadd.f32 %v667_v53, %v505_v49 }
  0xc5   : > { %1001 = vst.msk [vmem:[%s1166_s7 + $0x27] ss:$8 sm:$0x3] %vm1216_vm8, %v774_v57  ;;  %v491_v0 = vsub.f32 1.0, %v490_v55  ;;  %v516_v6 = vmul.f32 %v512_v54, %v1205_v16  ;;  %v546_v10 = vrot.slane %v1198_v8, 3  ;;  %vm495_vm0 = vweird.f32 %v1065_v50 }
  0xc6   : > { %v478_v4 = vadd.f32 %v1063_v39, %v477_v60  ;;  %v538_v12 = vmul.f32 %v534_v2, %v448_v36  ;;  %v544_v13 = vmul.f32 %v540_v3, %v448_v36  ;;  %v524_v15 = vmul.f32 %v520_v62, %v1205_v16  ;;  %vm496_vm2 = vmor %vm494_vm11, %vm495_vm0 }
  0xc7   : > { %v492_v11 = vmul.f32 %v1065_v50, %v491_v0  ;;  %v530_v19 = vmul.f32 %v526_v63, %v1195_v7  ;;  %v550_v20 = vmul.f32 %v546_v10, %v448_v36  ;;  %v1293_v29 = vadd.f32 %v555_v61, %v507_v43 }
  0xc8   : > { %v482_v14 = vsel %vm481_vm15, %v1063_v39, %v478_v4  ;;  %v588_v25 = vrot.slane %v544_v13, 7  ;;  %v630_v26 = vrot.slane %v538_v12, 6  ;;  %v675_v30 = vrot.slane %v671_v5, 1 }
  0xc9   : > { %v493_v22 = vadd.f32 %v1065_v50, %v492_v11  ;;  %v487_v24 = vsel %vm1245_vm10, %v486_v45, %v482_v14  ;;  %v572_v33 = vrot.slane %v550_v20, 7  ;;  %v1299_v43 = vadd.f32 %v613_v1, %v505_v49 }
  0xca   : > { %v488_v9 = vmul.f32 2.0, %v487_v24  ;;  %v592_v16 = vadd.f32 %v588_v25, %v524_v15  ;;  %v634_v35 = vsub.f32 %v530_v19, %v630_v26  ;;  %v644_v38 = vsub.f32 %v524_v15, %v588_v25 }
  0xcb   : > { %v497_v34 = vsel %vm496_vm2, %v1065_v50, %v493_v22  ;;  %v576_v41 = vsub.f32 %v516_v6, %v572_v33  ;;  %v602_v21 = vadd.f32 %v572_v33, %v516_v6  ;;  %v654_v60 = vadd.f32 %v630_v26, %v530_v19 }
  0xcc   : > { %v566_v36 = vmul.f32 %v562_v52, %v488_v9  ;;  %v678_v39 = vmul.f32 %v674_v59, %v488_v9  ;;  %v502_v40 = vsel %vm1268_vm13, %v501_v46, %v497_v34  ;;  %v596_v44 = vrot.slane %v592_v16, 1 }
  0xcd   : > { %v1297_v42 = vmul.f32 2.0, %v502_v40  ;;  %v624_v17 = vmul.f32 %v620_v58, %v488_v9  ;;  %v580_v18 = vrot.slane %v576_v41, 1  ;;  %v638_v51 = vrot.slane %v634_v35, 2 }
  0xce   : > { %v680_v45 = vsub.f32 1.0, %v678_v39  ;;  %v600_v53 = vmul.f32 %v596_v44, %v488_v9  ;;  %v606_v54 = vrot.slane %v602_v21, 1  ;;  %v757_v52 = vsel %vm727_vm14, %v1256_v47, %v1195_v7 }
  0xcf   : > { %v679_v50 = vmul.f32 %v675_v30, %v1297_v42  ;;  %v568_v46 = vsub.f32 1.0, %v566_v36  ;;  %v584_v55 = vmul.f32 %v580_v18, %v488_v9  ;;  %v626_v56 = vsub.f32 1.0, %v624_v17  ;;  %v783_v30 = vld [vmem:[%s1326_s11] sm:$0xff] }
  0xd0   : > { %1002 = vmatpush.msk.msrb.mxu2 %vm724_vm7, %v680_v45  ;;  %v642_v57 = vmul.f32 %v638_v51, %v488_v9  ;;  %v610_v49 = vmul.f32 %v606_v54, %v488_v9  ;;  %v648_v59 = vrot.slane %v644_v38, 1  ;;  %v690_v62 = vrot.slane %v600_v53, 6 }
  0xd1   : > { %v681_v58 = vsub.f32 1.0, %v679_v50  ;;  %v684_v61 = vrot.slane %v584_v55, 7  ;;  %v658_v47 = vrot.slane %v654_v60, 2  ;;  %v702_v63 = vrot.slane %v626_v56, 4 }
  0xd2   : > { %v652_v7 = vmul.f32 %v648_v59, %v488_v9  ;;  %v758_v0 = vsel %vm727_vm14, %v1261_v48, %v1214_v23  ;;  %v696_v1 = vrot.slane %v610_v49, 5  ;;  %v759_v3 = vsel %vm730_vm1, %v757_v52, %v1198_v8 }
  0xd3   : > { %1005 = vmatpush.msk.msrb.mxu3 %vm724_vm7, %v681_v58  ;;  %v725_v2 = vsel %vm724_vm7, %v568_v46, %v684_v61  ;;  %v760_v4 = vsel %vm730_vm1, %v758_v0, %v1223_v31  ;;  %v662_v5 = vmul.f32 %v658_v47, %v488_v9  ;;  %v708_v6 = vrot.slane %v642_v57, 3  ;;  %761 = vst [vmem:[%s1166_s7] sm:$0xf] %v759_v3 }
  0xd4   : > { %v728_v10 = vsel %vm727_vm14, %v725_v2, %v690_v62  ;;  %762 = vst [vmem:[%s1166_s7 + $0x8] sm:$0xf] %v760_v4  ;;  %v521_v48 = vrot.slane %v1223_v31, 2  ;;  %v535_v12 = vrot.slane %v1227_v32, 1  ;;  %v541_v13 = vrot.slane %v1214_v23, 2 }
  0xd5   : > { %v731_v11 = vsel %vm730_vm1, %v728_v10, %v696_v1  ;;  %v714_v8 = vrot.slane %v652_v7, 2  ;;  %v513_v15 = vrot.slane %v1214_v23, 1  ;;  %v720_v19 = vrot.slane %v662_v5, 1 }
  0xd6   : > { %v734_v14 = vsel %vm733_vm3, %v731_v11, %v702_v63  ;;  %v539_v22 = vmul.f32 %v535_v12, %v1235_v37  ;;  %v545_v24 = vmul.f32 %v541_v13, %v1235_v37  ;;  %v527_v26 = vrot.slane %v1223_v31, 1  ;;  %v331_v11 = vpop.permute.xlu1 %330 }
  0xd7   : > { %v737_v20 = vsel %vm736_vm4, %v734_v14, %v708_v6  ;;  %v547_v9 = vrot.slane %v1223_v31, 3  ;;  %vm785_vm8 = vcmask 72704   ;;  %v525_v34 = vmul.f32 %v521_v48, %v1227_v32  ;;  %v401_v14 = vpop.f32.mrf.mxu3 }
  0xd8   : > { %v740_v25 = vsel %vm739_vm5, %v737_v20, %v714_v8  ;;  %v589_v16 = vrot.slane %v545_v24, 7  ;;  %v631_v38 = vrot.slane %v539_v22, 6  ;;  %v621_v36 = vrot.slane %v1299_v43, 1  ;;  %v372_v8 = vpop.f32.mrf.mxu2 }
  0xd9   : > { %v743_v33 = vsel %vm742_vm6, %v740_v25, %v720_v19  ;;  %v551_v35 = vmul.f32 %v547_v9, %v1235_v37  ;;  %v563_v40 = vrot.slane %v1293_v29, 2  ;;  %v517_v31 = vmul.f32 %v513_v15, %v1227_v32  ;;  %v784_v29 = vld [vmem:[%s1326_s11 + $0x8] sm:$0x1] }
  0xda   : > { %813 = vmatpush.msrb.mxu2 %v743_v33  ;;  %v593_v39 = vadd.f32 %v589_v16, %v525_v34  ;;  %v531_v41 = vmul.f32 %v527_v26, %v1214_v23  ;;  %v625_v17 = vmul.f32 %v621_v36, %v1297_v42  ;;  %v645_v50 = vsub.f32 %v525_v34, %v589_v16 }
  0xdb   : > { %1003 = vmatmul.msk.f32.vlgmr.msrb.gmra.mxu2 %vm785_vm8, %v783_v30  ;;  %v573_v44 = vrot.slane %v551_v35, 7  ;;  %v567_v45 = vmul.f32 %v563_v40, %v1297_v42  ;;  %v373_v15 = vadd.f32 %v372_v8, %v331_v11  ;;  %v402_v19 = vadd.f32 %v401_v14, %v331_v11 }
  0xdc   : > { %v597_v21 = vrot.slane %v593_v39, 1  ;;  %v635_v51 = vsub.f32 %v531_v41, %v631_v38  ;;  %v655_v52 = vadd.f32 %v631_v38, %v531_v41  ;;  %v627_v46 = vsub.f32 1.0, %v625_v17 }
  0xdd   : > { %v577_v37 = vsub.f32 %v517_v31, %v573_v44  ;;  %v603_v18 = vadd.f32 %v573_v44, %v517_v31  ;;  %v569_v32 = vsub.f32 1.0, %v567_v45  ;;  %v649_v57 = vrot.slane %v645_v50, 1 }
  0xde   : > { %v601_v43 = vmul.f32 %v597_v21, %v1297_v42  ;;  %v639_v56 = vrot.slane %v635_v51, 2  ;;  %v659_v59 = vrot.slane %v655_v52, 2  ;;  %v703_v62 = vrot.slane %v627_v46, 4  ;;  %v321_v48 = vpop.permute.xlu1 %320 }
  0xdf   : > { %v581_v53 = vrot.slane %v577_v37, 1  ;;  %v607_v54 = vrot.slane %v603_v18, 1  ;;  %v653_v61 = vmul.f32 %v649_v57, %v1297_v42  ;;  %v367_v12 = vadd.f32 %v1180_v27, %v321_v48 }
  0xe0   : > { %v691_v58 = vrot.slane %v601_v43, 6  ;;  %v643_v49 = vmul.f32 %v639_v56, %v1297_v42  ;;  %v663_v7 = vmul.f32 %v659_v59, %v1297_v42  ;;  %v396_v13 = vadd.f32 %v1182_v28, %v321_v48 }
  0xe1   : > { %v585_v23 = vmul.f32 %v581_v53, %v1297_v42  ;;  %v611_v55 = vmul.f32 %v607_v54, %v1297_v42  ;;  %v715_v3 = vrot.slane %v653_v61, 2  ;;  %765 = vst [vmem:[%s1166_s7 + $0x10] sm:$0xff] %v367_v12  ;;  %v850_v20 = vrot.slane %v373_v15, 7 }
  0xe2   : > { %v709_v1 = vrot.slane %v643_v49, 3  ;;  %v721_v5 = vrot.slane %v663_v7, 1  ;;  %766 = vst [vmem:[%s1166_s7 + $0x18] sm:$0xff] %v396_v13  ;;  %v851_v22 = vrot.slane %v402_v19, 7 }
  0xe3   : > { %1004 = vmatmul.msk.f32.gmra.mxu2 %vm785_vm8, %v784_v29  ;;  %v685_v60 = vrot.slane %v585_v23, 7  ;;  %v697_v47 = vrot.slane %v611_v55, 5  ;;  %854 = vst [vmem:[%s1166_s7 + $0x40] sm:$0xe] %v850_v20 }
  0xe4   : > { %855 = vst [vmem:[%s1166_s7 + $0x48] sm:$0xe] %v851_v22 }
  0xe5   : > { %v726_v63 = vsel %vm724_vm7, %v569_v32, %v685_v60 }
  0xe6   : > { %v729_v0 = vsel %vm727_vm14, %v726_v63, %v691_v58 }
  0xe7   : > { %v732_v2 = vsel %vm730_vm1, %v729_v0, %v697_v47 }
  0xe8   : > { %v735_v4 = vsel %vm733_vm3, %v732_v2, %v703_v62 }
  0xe9   : > { %v738_v6 = vsel %vm736_vm4, %v735_v4, %v709_v1 }
  0xea   : > { %v741_v10 = vsel %vm739_vm5, %v738_v6, %v715_v3 }
  0xeb   : > { %v744_v42 = vsel %vm742_vm6, %v741_v10, %v721_v5 }
  0xec   : > { %836 = vmatpush.msrb.mxu3 %v744_v42 }
  0xed   : > { %1006 = vmatmul.msk.f32.vlgmr.msrb.gmra.mxu3 %vm785_vm8, %v783_v30 }
  0xf5   : > { %1007 = vmatmul.msk.f32.gmra.mxu3 %vm785_vm8, %v784_v29 }
 0x15e   : > { %v815_v24 = vpop.f32.mrf.mxu2 }
 0x15f   : > { %844 = vst [vmem:[%s1166_s7 + $0x30] sm:$0xff] %v815_v24 }
 0x166   : > { %v818_v25 = vpop.f32.mrf.mxu2 }
 0x167   : > { %846 = vst [vmem:[%s1166_s7 + $0x40] sm:$0x1] %v818_v25 }
 0x170   : > { %v838_v26 = vpop.f32.mrf.mxu3 }
 0x171   : > { %845 = vst [vmem:[%s1166_s7 + $0x38] sm:$0xff] %v838_v26 }
 0x178   : > { %v841_v27 = vpop.f32.mrf.mxu3 }
 0x179   : > { %847 = vst [vmem:[%s1166_s7 + $0x48] sm:$0x1] %v841_v27 }
 0x17a PF: > { %s14_s17 = sadd.s32 1, %s1088_s17   ;;  %s1394_s15 = smov %s1084_s16 }
 0x17b   : > { %p11_p5 = scmp.ge.s32.totalorder %s14_s17, 4   ;;  %s1395_s16 = smov %s1397_s18 }
 0x17d   :  { %13 = sbr.rel (!%p11_p5) target bundleno = 2 (0x2), region = 77 }

</bundles_post_ra>
